<compile_context>
chip_gen: v7x
topology: tpu7x:2x2x1
jax: 0.10.0
libtpu: 0.0.40
codegen_flags: <defaults>
</compile_context>

<pallas_src>
import functools

import jax
import jax.numpy as jnp
import numpy as np
from jax.experimental import pallas as pl
from jax.experimental.pallas import tpu as pltpu


def conv_gn_relu_kernel(x_ref, w_ref, g_ref, b_ref, o_ref, *, groups, eps, slope, W):
    """One batch block: fused 3x3 conv + GroupNorm + LeakyReLU, compact lane-dense layout.

    x_ref : (Nb, Cin_p, L_in)  top/bottom zero-padded input, spatial flattened with row
                               stride W (no width padding), bf16.  L_in = (H+4)*W.
    w_ref : (Cout, 9*Cin_p)    conv weight, columns ordered (kh, kw, cin), bf16.
    g_ref : (Cout, 1)          GroupNorm gamma (f32)
    b_ref : (Cout, 1)          GroupNorm beta  (f32)
    o_ref : (Nb, Cout, L)      output, L = H*W (fully valid, no garbage columns), bf16.
    """
    Nb, Cout, L = o_ref.shape
    cg = Cout // groups
    inv_cnt = 1.0 / float(cg * L)

    w = w_ref[...]                                   # (Cout, 9*Cin_p) bf16

    # In-kernel edge keep-masks (replace the old mask input stream): lanes where the
    # kw=0 / kw=2 taps would wrap around a row boundary are zeroed (that is exactly the
    # contribution the conv's width zero-padding would have supplied).
    col = jax.lax.broadcasted_iota(jnp.int32, (1, L), 1)
    if (W & (W - 1)) == 0:                           # power-of-two fast path
        wcol = jnp.bitwise_and(col, W - 1)
    else:
        wcol = jax.lax.rem(col, jnp.int32(W))
    keep_l = jnp.where(wcol != 0, 1.0, 0.0).astype(jnp.bfloat16)      # zero at w == 0
    keep_r = jnp.where(wcol != W - 1, 1.0, 0.0).astype(jnp.bfloat16)  # zero at w == W-1

    # ---- im2col: tap (kh, kw) of output column c reads flat index c + (kh+1)*W + kw - 1 ----
    xs = [x_ref[s] for s in range(Nb)]               # (Cin_p, L_in) bf16 each
    chunks = []
    for kh in range(3):
        for kw in range(3):
            off = (kh + 1) * W + kw - 1              # >= W-1 >= 0 (2 top pad rows)
            parts = []
            for s in range(Nb):
                sl = xs[s][:, off:off + L]           # (Cin_p, L) pure lane shift
                if kw == 0:
                    sl = sl * keep_l
                elif kw == 2:
                    sl = sl * keep_r
                parts.append(sl)
            chunks.append(parts[0] if Nb == 1 else jnp.concatenate(parts, axis=1))
    patches = jnp.concatenate(chunks, axis=0)        # (9*Cin_p, Nb*L) bf16

    # ---- single fused MXU matmul, shared weight load across the whole batch block ----
    acc = jnp.dot(w, patches, preferred_element_type=jnp.float32)     # (Cout, Nb*L) f32

    # ---- GroupNorm (two-pass centered variance, all lanes valid) + affine + LeakyReLU ----
    gamma = g_ref[...]
    beta = b_ref[...]
    for s in range(Nb):
        ys = []
        for g in range(groups):
            a = acc[g * cg:(g + 1) * cg, s * L:(s + 1) * L]           # (cg, L) f32
            mu = jnp.sum(jnp.sum(a, axis=1, keepdims=True),
                         axis=0, keepdims=True) * inv_cnt             # (1, 1)
            cen = a - mu
            var = jnp.sum(jnp.sum(cen * cen, axis=1, keepdims=True),
                          axis=0, keepdims=True) * inv_cnt            # (1, 1)
            scale = jax.lax.rsqrt(var + eps) * gamma[g * cg:(g + 1) * cg, :]
            yg = cen * scale + beta[g * cg:(g + 1) * cg, :]
            yg = jnp.where(yg > 0, yg, slope * yg)
            ys.append(yg)
        y = ys[0] if groups == 1 else jnp.concatenate(ys, axis=0)     # (Cout, L)
        o_ref[s] = y.astype(o_ref.dtype)                              # lane-dense bf16 store


@functools.partial(jax.jit, static_argnames=("groups", "eps", "slope"))
def conv_gn_relu(x_nchw, w_oihw, gamma, beta, *, groups, eps=1e-5, slope=0.2):
    """PyTorch ConvGNRelu forward. x: NCHW f32, weight: OIHW (nn.Conv2d layout).

    Returns NCHW bfloat16 (conv runs in bf16 with f32 accumulation; output stream kept bf16
    per perf guidance — cast in the caller if f32 output is required).
    """
    N, Cin, H, W = x_nchw.shape
    Cout = w_oihw.shape[0]
    L = H * W
    Cin_p = ((Cin + 7) // 8) * 8                     # full 8-sublane tap chunks
    L_in = (H + 4) * W                               # 2 top + 2 bottom zero rows

    # Batch blocking: whole batch in <= 2 grid steps, but >= 2 steps (both v7x TCs busy).
    n_blocks = 1 if N == 1 else 2
    Nb = pl.cdiv(N, n_blocks)
    N_pad = n_blocks * Nb

    # Input prep: cast (bf16) -> one zero-pad (batch, channel, top/bottom rows) -> free reshape.
    x_bf = x_nchw.astype(jnp.bfloat16)
    x_pad = jnp.pad(x_bf, ((0, N_pad - N), (0, Cin_p - Cin), (2, 2), (0, 0)))
    x_flat = x_pad.reshape(N_pad, Cin_p, L_in)       # contiguous reshape (no copy)

    # Weight: OIHW -> (Cout, kh, kw, Cin) -> zero-pad Cin -> (Cout, 9*Cin_p), matches patch rows.
    w_t = jnp.transpose(w_oihw, (0, 2, 3, 1))
    w_t = jnp.pad(w_t, ((0, 0), (0, 0), (0, 0), (0, Cin_p - Cin)))
    w_t = w_t.reshape(Cout, 9 * Cin_p).astype(jnp.bfloat16)
    g2 = gamma.reshape(Cout, 1).astype(jnp.float32)
    b2 = beta.reshape(Cout, 1).astype(jnp.float32)

    kern = functools.partial(conv_gn_relu_kernel, groups=groups, eps=eps, slope=slope, W=W)
    out = pl.pallas_call(
        kern,
        out_shape=jax.ShapeDtypeStruct((N_pad, Cout, L), jnp.bfloat16),
        grid_spec=pltpu.PrefetchScalarGridSpec(
            num_scalar_prefetch=0,
            grid=(n_blocks,),
            in_specs=[
                pl.BlockSpec((Nb, Cin_p, L_in), lambda b: (b, 0, 0)),
                pl.BlockSpec((Cout, 9 * Cin_p), lambda b: (0, 0)),
                pl.BlockSpec((Cout, 1), lambda b: (0, 0)),
                pl.BlockSpec((Cout, 1), lambda b: (0, 0)),
            ],
            out_specs=pl.BlockSpec((Nb, Cout, L), lambda b: (b, 0, 0)),
        ),
        compiler_params=pltpu.CompilerParams(
            dimension_semantics=("parallel",)),       # independent batch blocks -> megacore
    )(x_flat, w_t, g2, b2)

    # Kernel output is already compact NCHW channel-major: pure metadata reshape, no slice copy
    # (except when the batch had to be padded to a multiple of the block size).
    out = out.reshape(N_pad, Cout, H, W)
    if N_pad != N:
        out = out[:N]
    return out


def reference(x_nchw, w_oihw, gamma, beta, *, groups, eps=1e-5, slope=0.2):
    """Pure-JAX reference matching Conv2d(3x3, pad=1, no bias) + GroupNorm + LeakyReLU."""
    y = jax.lax.conv_general_dilated(
        x_nchw, w_oihw, window_strides=(1, 1), padding=((1, 1), (1, 1)),
        dimension_numbers=("NCHW", "OIHW", "NCHW"))
    N, C, H, W = y.shape
    yg = y.reshape(N, groups, C // groups, H, W)
    mean = yg.mean(axis=(2, 3, 4), keepdims=True)
    var = yg.var(axis=(2, 3, 4), keepdims=True)
    yn = ((yg - mean) / jnp.sqrt(var + eps)).reshape(N, C, H, W)
    yn = yn * gamma[None, :, None, None] + beta[None, :, None, None]
    return jnp.where(yn > 0, yn, slope * yn)


if __name__ == "__main__":
    # Small shapes consistent with the module: N=2, Cin=4, Cout=8, groups=2, 16x16.
    N, Cin, Cout, G, H, W = 2, 4, 8, 2, 16, 16

    key = jax.random.PRNGKey(0)
    kx, kw, kg, kb = jax.random.split(key, 4)
    x = jax.random.normal(kx, (N, Cin, H, W), dtype=jnp.float32)
    w_oihw = jax.random.normal(kw, (Cout, Cin, 3, 3), dtype=jnp.float32) * 0.1
    gamma = 1.0 + 0.1 * jax.random.normal(kg, (Cout,), dtype=jnp.float32)
    beta = 0.1 * jax.random.normal(kb, (Cout,), dtype=jnp.float32)

    out = jax.block_until_ready(conv_gn_relu(x, w_oihw, gamma, beta, groups=G))
    ref = jax.block_until_ready(reference(x, w_oihw, gamma, beta, groups=G))

    # Matmul operands and the stored output are bf16 (f32 accumulation) -> bf16-level tolerance.
    np.testing.assert_allclose(np.asarray(out).astype(np.float32), np.asarray(ref),
                               rtol=4e-2, atol=4e-2)

    print("KERNEL_OK")
</pallas_src>

<mosaic_0001>
module attributes {stable_mosaic.version = 11 : i64} {
  func.func @conv_gn_relu_kernel(%arg0: i32, %arg1: memref<1x8x320xbf16, #tpu.memory_space<vmem>>, %arg2: memref<8x72xbf16, #tpu.memory_space<vmem>>, %arg3: memref<8x1xf32, #tpu.memory_space<vmem>>, %arg4: memref<8x1xf32, #tpu.memory_space<vmem>>, %arg5: memref<1x8x256xbf16, #tpu.memory_space<vmem>>) attributes {dimension_semantics = [#tpu.dimension_semantics<parallel>], iteration_bounds = array<i64: 2>, scalar_prefetch = 0 : i64, scratch_operands = 0 : i64, tpu.core_type = #tpu.core_type<tc>, window_params = [{transform_indices = @transform_0, window_bounds = array<i64: 1, 8, 320>}, {pipeline_mode = #tpu.pipeline_mode<synchronous>, transform_indices = @transform_1, window_bounds = array<i64: 8, 72>}, {pipeline_mode = #tpu.pipeline_mode<synchronous>, transform_indices = @transform_2, window_bounds = array<i64: 8, 1>}, {pipeline_mode = #tpu.pipeline_mode<synchronous>, transform_indices = @transform_3, window_bounds = array<i64: 8, 1>}, {transform_indices = @transform_4, window_bounds = array<i64: 1, 8, 256>}]} {
    %c0 = arith.constant 0 : index
    %c0_0 = arith.constant 0 : index
    %0 = vector.load %arg2[%c0, %c0_0] : memref<8x72xbf16, #tpu.memory_space<vmem>>, vector<8x72xbf16>
    %1 = tpu.iota {dimensions = array<i32: 1>} : vector<1x256xi32>
    %c15_i32 = arith.constant 15 : i32
    %2 = vector.broadcast %c15_i32 : i32 to vector<1x256xi32>
    %3 = arith.andi %1, %2 : vector<1x256xi32>
    %c0_i32 = arith.constant 0 : i32
    %4 = vector.broadcast %c0_i32 : i32 to vector<1x256xi32>
    %5 = arith.cmpi ne, %3, %4 : vector<1x256xi32>
    %cst = arith.constant 1.000000e+00 : f32
    %cst_1 = arith.constant 0.000000e+00 : f32
    %6 = vector.broadcast %cst : f32 to vector<1x256xf32>
    %7 = vector.broadcast %cst_1 : f32 to vector<1x256xf32>
    %8 = arith.select %5, %6, %7 : vector<1x256xi1>, vector<1x256xf32>
    %9 = arith.truncf %8 : vector<1x256xf32> to vector<1x256xbf16>
    %c15_i32_2 = arith.constant 15 : i32
    %10 = vector.broadcast %c15_i32_2 : i32 to vector<1x256xi32>
    %11 = arith.cmpi ne, %3, %10 : vector<1x256xi32>
    %cst_3 = arith.constant 1.000000e+00 : f32
    %cst_4 = arith.constant 0.000000e+00 : f32
    %12 = vector.broadcast %cst_3 : f32 to vector<1x256xf32>
    %13 = vector.broadcast %cst_4 : f32 to vector<1x256xf32>
    %14 = arith.select %11, %12, %13 : vector<1x256xi1>, vector<1x256xf32>
    %15 = arith.truncf %14 : vector<1x256xf32> to vector<1x256xbf16>
    %c0_5 = arith.constant 0 : index
    %c0_6 = arith.constant 0 : index
    %c0_7 = arith.constant 0 : index
    %16 = vector.load %arg1[%c0_5, %c0_6, %c0_7] : memref<1x8x320xbf16, #tpu.memory_space<vmem>>, vector<1x8x320xbf16>
    %17 = vector.shape_cast %16 : vector<1x8x320xbf16> to vector<8x320xbf16>
    %18 = vector.extract_strided_slice %17 {offsets = [0, 15], sizes = [8, 256], strides = [1, 1]} : vector<8x320xbf16> to vector<8x256xbf16>
    %19 = vector.broadcast %9 : vector<1x256xbf16> to vector<8x256xbf16>
    %20 = arith.mulf %18, %19 : vector<8x256xbf16>
    %21 = vector.extract_strided_slice %17 {offsets = [0, 16], sizes = [8, 256], strides = [1, 1]} : vector<8x320xbf16> to vector<8x256xbf16>
    %22 = vector.extract_strided_slice %17 {offsets = [0, 17], sizes = [8, 256], strides = [1, 1]} : vector<8x320xbf16> to vector<8x256xbf16>
    %23 = vector.broadcast %15 : vector<1x256xbf16> to vector<8x256xbf16>
    %24 = arith.mulf %22, %23 : vector<8x256xbf16>
    %25 = vector.extract_strided_slice %17 {offsets = [0, 31], sizes = [8, 256], strides = [1, 1]} : vector<8x320xbf16> to vector<8x256xbf16>
    %26 = vector.broadcast %9 : vector<1x256xbf16> to vector<8x256xbf16>
    %27 = arith.mulf %25, %26 : vector<8x256xbf16>
    %28 = vector.extract_strided_slice %17 {offsets = [0, 32], sizes = [8, 256], strides = [1, 1]} : vector<8x320xbf16> to vector<8x256xbf16>
    %29 = vector.extract_strided_slice %17 {offsets = [0, 33], sizes = [8, 256], strides = [1, 1]} : vector<8x320xbf16> to vector<8x256xbf16>
    %30 = vector.broadcast %15 : vector<1x256xbf16> to vector<8x256xbf16>
    %31 = arith.mulf %29, %30 : vector<8x256xbf16>
    %32 = vector.extract_strided_slice %17 {offsets = [0, 47], sizes = [8, 256], strides = [1, 1]} : vector<8x320xbf16> to vector<8x256xbf16>
    %33 = vector.broadcast %9 : vector<1x256xbf16> to vector<8x256xbf16>
    %34 = arith.mulf %32, %33 : vector<8x256xbf16>
    %35 = vector.extract_strided_slice %17 {offsets = [0, 48], sizes = [8, 256], strides = [1, 1]} : vector<8x320xbf16> to vector<8x256xbf16>
    %36 = vector.extract_strided_slice %17 {offsets = [0, 49], sizes = [8, 256], strides = [1, 1]} : vector<8x320xbf16> to vector<8x256xbf16>
    %37 = vector.broadcast %15 : vector<1x256xbf16> to vector<8x256xbf16>
    %38 = arith.mulf %36, %37 : vector<8x256xbf16>
    %39 = tpu.concatenate %20, %21, %24, %27, %28, %31, %34, %35, %38 in 0 : vector<8x256xbf16>, vector<8x256xbf16>, vector<8x256xbf16>, vector<8x256xbf16>, vector<8x256xbf16>, vector<8x256xbf16>, vector<8x256xbf16>, vector<8x256xbf16>, vector<8x256xbf16> -> vector<72x256xbf16>
    %cst_8 = arith.constant dense<0.000000e+00> : vector<8x256xf32>
    %40 = tpu.matmul %0, %39, %cst_8 {dimension_numbers = #tpu.dot_dimension_numbers<[1], [0], [0], [1], [0, 0, 1, 1], [], []>} : vector<8x72xbf16>, vector<72x256xbf16>, vector<8x256xf32> -> vector<8x256xf32>
    %c0_9 = arith.constant 0 : index
    %c0_10 = arith.constant 0 : index
    %41 = vector.load %arg3[%c0_9, %c0_10] : memref<8x1xf32, #tpu.memory_space<vmem>>, vector<8x1xf32>
    %c0_11 = arith.constant 0 : index
    %c0_12 = arith.constant 0 : index
    %42 = vector.load %arg4[%c0_11, %c0_12] : memref<8x1xf32, #tpu.memory_space<vmem>>, vector<8x1xf32>
    %43 = vector.extract_strided_slice %40 {offsets = [0, 0], sizes = [4, 256], strides = [1, 1]} : vector<8x256xf32> to vector<4x256xf32>
    %cst_13 = arith.constant dense<0.000000e+00> : vector<4xf32>
    %44 = vector.multi_reduction <add>, %43, %cst_13 [1] : vector<4x256xf32> to vector<4xf32>
    %45 = vector.shape_cast %44 : vector<4xf32> to vector<4x1xf32>
    %cst_14 = arith.constant dense<0.000000e+00> : vector<1xf32>
    %46 = vector.multi_reduction <add>, %45, %cst_14 [0] : vector<4x1xf32> to vector<1xf32>
    %47 = vector.shape_cast %46 : vector<1xf32> to vector<1x1xf32>
    %cst_15 = arith.constant 9.765625E-4 : f32
    %48 = vector.broadcast %cst_15 : f32 to vector<1x1xf32>
    %49 = arith.mulf %47, %48 : vector<1x1xf32>
    %50 = vector.broadcast %49 : vector<1x1xf32> to vector<4x256xf32>
    %51 = arith.subf %43, %50 : vector<4x256xf32>
    %52 = arith.mulf %51, %51 : vector<4x256xf32>
    %cst_16 = arith.constant dense<0.000000e+00> : vector<4xf32>
    %53 = vector.multi_reduction <add>, %52, %cst_16 [1] : vector<4x256xf32> to vector<4xf32>
    %54 = vector.shape_cast %53 : vector<4xf32> to vector<4x1xf32>
    %cst_17 = arith.constant dense<0.000000e+00> : vector<1xf32>
    %55 = vector.multi_reduction <add>, %54, %cst_17 [0] : vector<4x1xf32> to vector<1xf32>
    %56 = vector.shape_cast %55 : vector<1xf32> to vector<1x1xf32>
    %cst_18 = arith.constant 9.765625E-4 : f32
    %57 = vector.broadcast %cst_18 : f32 to vector<1x1xf32>
    %58 = arith.mulf %56, %57 : vector<1x1xf32>
    %cst_19 = arith.constant 9.99999974E-6 : f32
    %59 = vector.broadcast %cst_19 : f32 to vector<1x1xf32>
    %60 = arith.addf %58, %59 : vector<1x1xf32>
    %61 = math.rsqrt %60 : vector<1x1xf32>
    %62 = vector.extract_strided_slice %41 {offsets = [0, 0], sizes = [4, 1], strides = [1, 1]} : vector<8x1xf32> to vector<4x1xf32>
    %63 = vector.broadcast %61 : vector<1x1xf32> to vector<4x1xf32>
    %64 = arith.mulf %63, %62 : vector<4x1xf32>
    %65 = vector.broadcast %64 : vector<4x1xf32> to vector<4x256xf32>
    %66 = arith.mulf %51, %65 : vector<4x256xf32>
    %67 = vector.extract_strided_slice %42 {offsets = [0, 0], sizes = [4, 1], strides = [1, 1]} : vector<8x1xf32> to vector<4x1xf32>
    %68 = vector.broadcast %67 : vector<4x1xf32> to vector<4x256xf32>
    %69 = arith.addf %66, %68 : vector<4x256xf32>
    %cst_20 = arith.constant 0.000000e+00 : f32
    %70 = vector.broadcast %cst_20 : f32 to vector<4x256xf32>
    %71 = arith.cmpf ogt, %69, %70 : vector<4x256xf32>
    %cst_21 = arith.constant 2.000000e-01 : f32
    %72 = vector.broadcast %cst_21 : f32 to vector<4x256xf32>
    %73 = arith.mulf %72, %69 : vector<4x256xf32>
    %74 = arith.select %71, %69, %73 : vector<4x256xi1>, vector<4x256xf32>
    %75 = vector.extract_strided_slice %40 {offsets = [4, 0], sizes = [4, 256], strides = [1, 1]} : vector<8x256xf32> to vector<4x256xf32>
    %cst_22 = arith.constant dense<0.000000e+00> : vector<4xf32>
    %76 = vector.multi_reduction <add>, %75, %cst_22 [1] : vector<4x256xf32> to vector<4xf32>
    %77 = vector.shape_cast %76 : vector<4xf32> to vector<4x1xf32>
    %cst_23 = arith.constant dense<0.000000e+00> : vector<1xf32>
    %78 = vector.multi_reduction <add>, %77, %cst_23 [0] : vector<4x1xf32> to vector<1xf32>
    %79 = vector.shape_cast %78 : vector<1xf32> to vector<1x1xf32>
    %cst_24 = arith.constant 9.765625E-4 : f32
    %80 = vector.broadcast %cst_24 : f32 to vector<1x1xf32>
    %81 = arith.mulf %79, %80 : vector<1x1xf32>
    %82 = vector.broadcast %81 : vector<1x1xf32> to vector<4x256xf32>
    %83 = arith.subf %75, %82 : vector<4x256xf32>
    %84 = arith.mulf %83, %83 : vector<4x256xf32>
    %cst_25 = arith.constant dense<0.000000e+00> : vector<4xf32>
    %85 = vector.multi_reduction <add>, %84, %cst_25 [1] : vector<4x256xf32> to vector<4xf32>
    %86 = vector.shape_cast %85 : vector<4xf32> to vector<4x1xf32>
    %cst_26 = arith.constant dense<0.000000e+00> : vector<1xf32>
    %87 = vector.multi_reduction <add>, %86, %cst_26 [0] : vector<4x1xf32> to vector<1xf32>
    %88 = vector.shape_cast %87 : vector<1xf32> to vector<1x1xf32>
    %cst_27 = arith.constant 9.765625E-4 : f32
    %89 = vector.broadcast %cst_27 : f32 to vector<1x1xf32>
    %90 = arith.mulf %88, %89 : vector<1x1xf32>
    %cst_28 = arith.constant 9.99999974E-6 : f32
    %91 = vector.broadcast %cst_28 : f32 to vector<1x1xf32>
    %92 = arith.addf %90, %91 : vector<1x1xf32>
    %93 = math.rsqrt %92 : vector<1x1xf32>
    %94 = vector.extract_strided_slice %41 {offsets = [4, 0], sizes = [4, 1], strides = [1, 1]} : vector<8x1xf32> to vector<4x1xf32>
    %95 = vector.broadcast %93 : vector<1x1xf32> to vector<4x1xf32>
    %96 = arith.mulf %95, %94 : vector<4x1xf32>
    %97 = vector.broadcast %96 : vector<4x1xf32> to vector<4x256xf32>
    %98 = arith.mulf %83, %97 : vector<4x256xf32>
    %99 = vector.extract_strided_slice %42 {offsets = [4, 0], sizes = [4, 1], strides = [1, 1]} : vector<8x1xf32> to vector<4x1xf32>
    %100 = vector.broadcast %99 : vector<4x1xf32> to vector<4x256xf32>
    %101 = arith.addf %98, %100 : vector<4x256xf32>
    %cst_29 = arith.constant 0.000000e+00 : f32
    %102 = vector.broadcast %cst_29 : f32 to vector<4x256xf32>
    %103 = arith.cmpf ogt, %101, %102 : vector<4x256xf32>
    %cst_30 = arith.constant 2.000000e-01 : f32
    %104 = vector.broadcast %cst_30 : f32 to vector<4x256xf32>
    %105 = arith.mulf %104, %101 : vector<4x256xf32>
    %106 = arith.select %103, %101, %105 : vector<4x256xi1>, vector<4x256xf32>
    %107 = tpu.concatenate %74, %106 in 0 : vector<4x256xf32>, vector<4x256xf32> -> vector<8x256xf32>
    %108 = arith.truncf %107 : vector<8x256xf32> to vector<8x256xbf16>
    %c0_31 = arith.constant 0 : index
    %c0_32 = arith.constant 0 : index
    %c0_33 = arith.constant 0 : index
    %109 = vector.load %arg5[%c0_31, %c0_32, %c0_33] : memref<1x8x256xbf16, #tpu.memory_space<vmem>>, vector<1x8x256xbf16>
    %110 = vector.shape_cast %109 : vector<1x8x256xbf16> to vector<8x256xbf16>
    %111 = vector.shape_cast %108 : vector<8x256xbf16> to vector<1x8x256xbf16>
    tpu.vector_store %arg5[%c0_31, %c0_32, %c0_33], %111 {strides = array<i32>} : memref<1x8x256xbf16, #tpu.memory_space<vmem>>, vector<1x8x256xbf16>,
    return
  }
  func.func @transform_0(%arg0: i32) -> (i32, i32, i32) {
    %c0_i32 = arith.constant 0 : i32
    %c0_i32_0 = arith.constant 0 : i32
    %c0_i32_1 = arith.constant 0 : i32
    return %arg0, %c0_i32, %c0_i32_0 : i32, i32, i32
  }
  func.func @transform_1(%arg0: i32) -> (i32, i32) {
    %c0_i32 = arith.constant 0 : i32
    %c0_i32_0 = arith.constant 0 : i32
    %c0_i32_1 = arith.constant 0 : i32
    return %c0_i32, %c0_i32_0 : i32, i32
  }
  func.func @transform_2(%arg0: i32) -> (i32, i32) {
    %c0_i32 = arith.constant 0 : i32
    %c0_i32_0 = arith.constant 0 : i32
    %c0_i32_1 = arith.constant 0 : i32
    return %c0_i32, %c0_i32_0 : i32, i32
  }
  func.func @transform_3(%arg0: i32) -> (i32, i32) {
    %c0_i32 = arith.constant 0 : i32
    %c0_i32_0 = arith.constant 0 : i32
    %c0_i32_1 = arith.constant 0 : i32
    return %c0_i32, %c0_i32_0 : i32, i32
  }
  func.func @transform_4(%arg0: i32) -> (i32, i32, i32) {
    %c0_i32 = arith.constant 0 : i32
    %c0_i32_0 = arith.constant 0 : i32
    %c0_i32_1 = arith.constant 0 : i32
    return %arg0, %c0_i32, %c0_i32_0 : i32, i32, i32
  }
}

</mosaic_0001>

<bundles_post_ra>
// kernel: conv_gn_relu.1
= control target key start
LH: loop header
LB: loop body
LE: loop exit
PB: predicated region body
PF: predicated region fallthrough
CT: control target
= control target key end

     0   :  { %s861_s15 = smov 0   ;;  %s986_s0 = inlined_call_operand.vmem [shape: bf16[2,8,320], index: 0, kind: input, shape index: {}]   ;;  %s987_s1 = inlined_call_operand.vmem [shape: bf16[8,72], index: 1, kind: input, shape index: {}]   ;;  %s988_s2 = inlined_call_operand.vmem [shape: f32[8,1], index: 2, kind: input, shape index: {}]   ;;  %s989_s3 = inlined_call_operand.vmem [shape: f32[8,1], index: 3, kind: input, shape index: {}]   ;;  %s990_s4 = inlined_call_operand.vmem [shape: bf16[2,8,256], index: 4, kind: output, shape index: {}]  }
   0x1 LB: > { %s736_s16 = sadd.s32 4294967295, %s817_s15   ;;  %p740_p0 = scmp.ge.s32.totalorder %s817_s15, 1  ;;  %s817_s15 = sphi %s861_s15, %s14_s15  }
   0x2   : > { %p162_p1 = scmp.lt.s32.totalorder %s817_s15, 3 }
   0x4   : > { %p163_p2 = pnand %p740_p0, %p162_p1 }
   0x5   : > { %v200_v0 = vlaneseq (!%p163_p2)  ;;  %p188_p3 = scmp.lt.s32.totalorder (!%p163_p2), %s736_s16, 1  ;;  %v819_v5 = vmov (!%p163_p2), 0.0   ;;  %s820_s21 = smov (!%p163_p2), 17   ;;  %vm241_vm4 = vcmask (!%p163_p2), 138240   ;;  %vm250_vm5 = vcmask (!%p163_p2), 252928  }
   0x6   : > { %166 = sbr.rel (%p163_p2) target bundleno = 1104 (0x450), region = 36  ;;  %s821_s22 = smov (!%p163_p2), 33   ;;  %vm259_vm6 = vcmask (!%p163_p2), 269312   ;;  %vm268_vm7 = vcmask (!%p163_p2), 384000   ;;  %vm277_vm8 = vcmask (!%p163_p2), 400384   ;;  %vm227_vm9 = vcmask (!%p163_p2), 121856  }
   0x7   : > { %v201_v1 = vand.u32 (!%p163_p2), 127, %v200_v0  ;;  %s822_s23 = smov (!%p163_p2), 31   ;;  %s823_s24 = smov (!%p163_p2), 47   ;;  %vm305_vm10 = vcmask (!%p163_p2), 1039360   ;;  %vm411_vm11 = vcmask (!%p163_p2), 1043456   ;;  %vm339_vm12 = vcmask (!%p163_p2), 916480  }
   0x8   : > { %s824_s25 = smov (!%p163_p2), 49   ;;  %s825_s26 = smov (!%p163_p2), 127   ;;  %vm322_vm13 = vcmask (!%p163_p2), 1031168   ;;  %vm365_vm14 = vcmask (!%p163_p2), 900096   ;;  %vm348_vm15 = vcmask (!%p163_p2), 908288  }
   0x9   : > { %v202_v2 = vadd.s32 (!%p163_p2), 128, %v201_v1  ;;  %v203_v3 = vand.u32 (!%p163_p2), 15, %v201_v1  ;;  %s826_s27 = smov (!%p163_p2), 15   ;;  %s827_s28 = smov (!%p163_p2), 111  }
   0xa   : > { %s828_s29 = smov (!%p163_p2), 95   ;;  %s829_s30 = smov (!%p163_p2), 126  }
   0xb   : > { %v204_v4 = vand.u32 (!%p163_p2), 15, %v202_v2  ;;  %vm211_vm0 = vcmp.ne.s32.totalorder (!%p163_p2), %v203_v3, 15  ;;  %vm205_vm1 = vcmp.ne.s32.totalorder (!%p163_p2), %v203_v3, 0  ;;  %s830_s5 = smov (!%p163_p2), 112   ;;  %s831_s6 = smov (!%p163_p2), 110  }
   0xc   : > { %v213_v6 = vsel (!%p163_p2), %vm211_vm0, 1.0, %v819_v5  ;;  %v207_v8 = vsel (!%p163_p2), %vm205_vm1, 1.0, %v819_v5  ;;  %s832_s7 = smov (!%p163_p2), 96   ;;  %s833_s8 = smov (!%p163_p2), 94   ;;  %vm382_vm0 = vcmask (!%p163_p2), 785408   ;;  %vm391_vm1 = vcmask (!%p163_p2), 777216  }
   0xd   : > { %s992_s16 = smov (!%p188_p3, %s736_s16), 1  ;;  %vm212_vm2 = vcmp.ne.s32.totalorder %v204_v4, 15  ;;  %vm206_vm3 = vcmp.ne.s32.totalorder %v204_v4, 0  ;;  %s834_s9 = smov 113  }
   0xe   : > { %s776_s17 = smul.u32 12, %s992_s16  ;;  %v214_v7 = vsel %vm212_vm2, 1.0, %v819_v5  ;;  %v208_v9 = vsel %vm206_vm3, 1.0, %v819_v5  ;;  %vm408_vm2 = vcmask 769024   ;;  %vm490_vm3 = vcmask 924672   ;;  %s772_s18 = sshll.u32 %s992_s16, 3 }
   0xf   : > { %v774_v10 = vpack.c.bf16 %v214_v7, %v213_v6  ;;  %v773_v11 = vpack.c.bf16 %v208_v9, %v207_v8 }
  0x10   : > { %s192_s20 = scalar_lea.vmem %s986_s0, %s776_s17 }
  0x11   : > { %238 = vrot.lane.b32.xlu0 %v774_v10, %s820_s21  ;;  %256 = vrot.lane.b32.xlu1 %v774_v10, %s821_s22  ;;  %v875_v12 = vld [vmem:[%s192_s20 + $0x8] sm:$0xf]  ;;  %v879_v14 = vld [vmem:[%s192_s20] sm:$0xff]  ;;  %s197_s21 = scalar_lea.vmem %s990_s4, %s772_s18 }
  0x12   : > { %v751_v13 = vcombine.low %v875_v12, %v875_v12  ;;  %v750_v15 = vcombine.high %v879_v14, %v879_v14  ;;  %v885_v16 = vcombine.low %v879_v14, %v879_v14 }
  0x15   : > { %247 = vrot.lane.b32.xlu0 %v773_v11, %s822_s23  ;;  %265 = vrot.lane.b32.xlu1 %v773_v11, %s823_s24 }
  0x19   : > { %274 = vrot.lane.b32.xlu0 %v774_v10, %s824_s25  ;;  %303 = vrot.lane.b32.xlu1 %v751_v13, %s825_s26 }
  0x1d   : > { %224 = vrot.lane.b32.xlu1 %v773_v11, %s826_s27  ;;  %301 = vrot.lane.b32.xlu0 %v750_v15, %s825_s26 }
  0x21   : > { %299 = vrot.lane.b32.xlu0 %v885_v16, %s825_s26  ;;  %344 = vrot.lane.b32.xlu1 %v750_v15, %s827_s28 }
  0x25   : > { %342 = vrot.lane.b32.xlu1 %v885_v16, %s827_s28  ;;  %346 = vrot.lane.b32.xlu0 %v751_v13, %s827_s28 }
  0x29   : > { %387 = vrot.lane.b32.xlu1 %v750_v15, %s828_s29  ;;  %389 = vrot.lane.b32.xlu0 %v751_v13, %s828_s29 }
  0x83   : > { %v239_v17 = vpop.permute.xlu0 %238  ;;  %v257_v18 = vpop.permute.xlu1 %256 }
  0x84   : > { %v240_v19 = vrot.slane %v239_v17, 4  ;;  %v258_v25 = vrot.slane %v257_v18, 4 }
  0x86   : > { %v242_v20 = vsel %vm241_vm4, %v240_v19, %v239_v17  ;;  %v246_v21 = vmul.bf16 %v240_v19, %v875_v12  ;;  %v264_v31 = vmul.bf16 %v258_v25, %v875_v12  ;;  %v260_v36 = vsel %vm259_vm6, %v258_v25, %v257_v18 }
  0x87   : > { %v245_v22 = vmul.bf16 %v242_v20, %v879_v14  ;;  %v248_v23 = vpop.permute.xlu0 %247  ;;  %v266_v28 = vpop.permute.xlu1 %265  ;;  %v263_v40 = vmul.bf16 %v260_v36, %v879_v14  ;;  %vm509_vm4 = vcmask 588800  }
  0x88   : > { %v249_v24 = vrot.slane %v248_v23, 4  ;;  %v754_v26 = vcombine.low %v246_v21, %v246_v21  ;;  %v267_v33 = vrot.slane %v266_v28, 4  ;;  %v760_v38 = vcombine.low %v264_v31, %v264_v31 }
  0x89   : > { %v753_v27 = vcombine.high %v245_v22, %v245_v22  ;;  %v752_v41 = vcombine.low %v245_v22, %v245_v22  ;;  %v759_v47 = vcombine.high %v263_v40, %v263_v40  ;;  %v758_v54 = vcombine.low %v263_v40, %v263_v40 }
  0x8a   : > { %v251_v29 = vsel %vm250_vm5, %v249_v24, %v248_v23  ;;  %v255_v30 = vmul.bf16 %v249_v24, %v875_v12  ;;  %320 = vrot.lane.b32.xlu0 %v754_v26, %s829_s30  ;;  %v273_v37 = vmul.bf16 %v267_v33, %v875_v12  ;;  %v269_v43 = vsel %vm268_vm7, %v267_v33, %v266_v28 }
  0x8b   : > { %v254_v32 = vmul.bf16 %v251_v29, %v879_v14  ;;  %318 = vrot.lane.b32.xlu1 %v753_v27, %s829_s30  ;;  %v304_v39 = vpop.permute.xlu1 %303  ;;  %v275_v42 = vpop.permute.xlu0 %274  ;;  %v272_v46 = vmul.bf16 %v269_v43, %v879_v14  ;;  %vm615_vm5 = vcmask 1047556  }
  0x8c   : > { %v757_v34 = vcombine.low %v255_v30, %v255_v30  ;;  %v763_v44 = vcombine.low %v273_v37, %v273_v37  ;;  %v276_v45 = vrot.slane %v275_v42, 4 }
  0x8d   : > { %v756_v35 = vcombine.high %v254_v32, %v254_v32  ;;  %v755_v49 = vcombine.low %v254_v32, %v254_v32  ;;  %v762_v52 = vcombine.high %v272_v46, %v272_v46  ;;  %v761_v56 = vcombine.low %v272_v46, %v272_v46 }
  0x8e   : > { %337 = vrot.lane.b32.xlu0 %v757_v34, %s830_s5  ;;  %v278_v50 = vsel %vm277_vm8, %v276_v45, %v275_v42  ;;  %v282_v61 = vmul.bf16 %v276_v45, %v875_v12  ;;  %v835_v45 = vmov 0  }
  0x8f   : > { %335 = vrot.lane.b32.xlu1 %v756_v35, %s830_s5  ;;  %v225_v48 = vpop.permute.xlu1 %224  ;;  %v281_v53 = vmul.bf16 %v278_v50, %v879_v14  ;;  %v302_v59 = vpop.permute.xlu0 %301  ;;  %551 = vmatprep.mubr.bf16.mxu0 %v835_v45 }
  0x90   : > { %v226_v51 = vrot.slane %v225_v48, 4  ;;  %v307_v1 = vsel %vm305_vm10, %v302_v59, %v304_v39  ;;  %v766_v2 = vcombine.low %v282_v61, %v282_v61  ;;  %802 = vset.pattern.permute.xlu0 %v835_v45  ;;  %803 = vset.pattern.permute.xlu1 %v835_v45 }
  0x91   : > { %v764_v57 = vcombine.low %v281_v53, %v281_v53  ;;  %v765_v63 = vcombine.high %v281_v53, %v281_v53 }
  0x92   : > { %363 = vrot.lane.b32.xlu0 %v760_v38, %s831_s6  ;;  %v228_v55 = vsel %vm227_vm9, %v226_v51, %v225_v48  ;;  %v232_v60 = vmul.bf16 %v226_v51, %v875_v12 }
  0x93   : > { %316 = vrot.lane.b32.xlu1 %v752_v41, %s829_s30  ;;  %v231_v58 = vmul.bf16 %v228_v55, %v879_v14  ;;  %v300_v3 = vpop.permute.xlu0 %299  ;;  %v345_v9 = vpop.permute.xlu1 %344 }
  0x94   : > { %v748_v0 = vcombine.low %v232_v60, %v232_v60  ;;  %v306_v6 = vsel %vm305_vm10, %v300_v3, %v302_v59 }
  0x95   : > { %v747_v62 = vcombine.high %v231_v58, %v231_v58  ;;  %v746_v4 = vcombine.low %v231_v58, %v231_v58 }
  0x96   : > { %380 = vrot.lane.b32.xlu0 %v763_v44, %s832_s7  ;;  %v420_v7 = vsel %vm411_vm11, %v748_v0, %v304_v39 }
  0x97   : > { %361 = vrot.lane.b32.xlu1 %v759_v47, %s831_s6  ;;  %v417_v5 = vsel %vm411_vm11, %v747_v62, %v307_v1  ;;  %v414_v8 = vsel %vm411_vm11, %v746_v4, %v306_v6  ;;  %v347_v10 = vpop.permute.xlu0 %346  ;;  %v343_v11 = vpop.permute.xlu1 %342 }
  0x98   : > { %v350_v29 = vsel %vm348_vm15, %v345_v9, %v347_v10  ;;  %v349_v38 = vsel %vm348_vm15, %v343_v11, %v345_v9 }
  0x9a   : > { %333 = vrot.lane.b32.xlu0 %v755_v49, %s830_s5 }
  0x9b   : > { %378 = vrot.lane.b32.xlu1 %v762_v52, %s832_s7  ;;  %v390_v12 = vpop.permute.xlu0 %389  ;;  %v388_v13 = vpop.permute.xlu1 %387 }
  0x9c   : > { %v393_v39 = vsel %vm391_vm1, %v388_v13, %v390_v12 }
  0x9e   : > { %359 = vrot.lane.b32.xlu0 %v758_v54, %s831_s6 }
  0x9f   : > { %376 = vrot.lane.b32.xlu1 %v761_v56, %s832_s7 }
  0xa2   : > { %385 = vrot.lane.b32.xlu0 %v885_v16, %s828_s29 }
  0xa3   : > { %402 = vrot.lane.b32.xlu1 %v764_v57, %s833_s8 }
  0xa6   : > { %404 = vrot.lane.b32.xlu0 %v765_v63, %s833_s8 }
  0xa7   : > { %406 = vrot.lane.b32.xlu1 %v766_v2, %s833_s8 }
  0xaa   : > { %462 = vrot.lane.b32.xlu0 %v417_v5, %s834_s9 }
  0xab   : > { %464 = vrot.lane.b32.xlu1 %v420_v7, %s834_s9 }
  0xae   : > { %460 = vrot.lane.b32.xlu0 %v414_v8, %s834_s9 }
  0xfc   : > { %v321_v14 = vpop.permute.xlu0 %320 }
  0xfd   : > { %v319_v15 = vpop.permute.xlu1 %318 }
  0xfe   : > { %v324_v23 = vsel %vm322_vm13, %v319_v15, %v321_v14 }
 0x100   : > { %v338_v16 = vpop.permute.xlu0 %337 }
 0x101   : > { %v336_v17 = vpop.permute.xlu1 %335  ;;  %v429_v18 = vsel %vm411_vm11, %v321_v14, %v338_v16 }
 0x102   : > { %470 = vrot.lane.b32.xlu0 %v429_v18, %s834_s9  ;;  %v341_v22 = vsel %vm339_vm12, %v336_v17, %v338_v16  ;;  %v199_v16 = vld [vmem:[%s987_s1] sm:$0xf] }
 0x103   : > { %v426_v26 = vsel %vm411_vm11, %v324_v23, %v341_v22 }
 0x104   : > { %v364_v19 = vpop.permute.xlu0 %363 }
 0x105   : > { %v317_v20 = vpop.permute.xlu1 %316  ;;  %v438_v21 = vsel %vm411_vm11, %v347_v10, %v364_v19 }
 0x106   : > { %476 = vrot.lane.b32.xlu1 %v438_v21, %s834_s9  ;;  %v323_v31 = vsel %vm322_vm13, %v317_v20, %v319_v15 }
 0x108   : > { %v381_v24 = vpop.permute.xlu0 %380 }
 0x109   : > { %v362_v25 = vpop.permute.xlu1 %361  ;;  %v447_v27 = vsel %vm411_vm11, %v381_v24, %v390_v12 }
 0x10a   : > { %v367_v28 = vsel %vm365_vm14, %v362_v25, %v364_v19  ;;  %468 = vrot.lane.b32.xlu1 %v426_v26, %s834_s9  ;;  %482 = vrot.lane.b32.xlu0 %v447_v27, %s834_s9 }
 0x10b   : > { %v435_v34 = vsel %vm411_vm11, %v350_v29, %v367_v28 }
 0x10c   : > { %v334_v30 = vpop.permute.xlu0 %333 }
 0x10d   : > { %v340_v32 = vsel %vm339_vm12, %v334_v30, %v336_v17  ;;  %v379_v33 = vpop.permute.xlu1 %378 }
 0x10e   : > { %474 = vrot.lane.b32.xlu0 %v435_v34, %s834_s9  ;;  %v423_v35 = vsel %vm411_vm11, %v323_v31, %v340_v32  ;;  %v384_v36 = vsel %vm382_vm0, %v379_v33, %v381_v24 }
 0x10f   : > { %466 = vrot.lane.b32.xlu1 %v423_v35, %s834_s9  ;;  %v444_v42 = vsel %vm411_vm11, %v384_v36, %v393_v39 }
 0x110   : > { %v360_v37 = vpop.permute.xlu0 %359 }
 0x111   : > { %v366_v40 = vsel %vm365_vm14, %v360_v37, %v362_v25  ;;  %v377_v41 = vpop.permute.xlu1 %376 }
 0x112   : > { %v432_v43 = vsel %vm411_vm11, %v349_v38, %v366_v40  ;;  %v383_v46 = vsel %vm382_vm0, %v377_v41, %v379_v33 }
 0x113   : > { %480 = vrot.lane.b32.xlu1 %v444_v42, %s834_s9  ;;  %472 = vrot.lane.b32.xlu0 %v432_v43, %s834_s9 }
 0x114   : > { %v386_v44 = vpop.permute.xlu0 %385 }
 0x115   : > { %v392_v47 = vsel %vm391_vm1, %v386_v44, %v388_v13  ;;  %v403_v48 = vpop.permute.xlu1 %402 }
 0x116   : > { %v441_v49 = vsel %vm411_vm11, %v383_v46, %v392_v47 }
 0x117   : > { %478 = vrot.lane.b32.xlu1 %v441_v49, %s834_s9 }
 0x118   : > { %v405_v50 = vpop.permute.xlu0 %404 }
 0x119   : > { %v407_v51 = vpop.permute.xlu1 %406  ;;  %v409_v52 = vsel %vm408_vm2, %v403_v48, %v405_v50 }
 0x11a   : > { %484 = vrot.lane.b32.xlu0 %v409_v52, %s834_s9  ;;  %v410_v53 = vsel %vm408_vm2, %v405_v50, %v407_v51 }
 0x11b   : > { %486 = vrot.lane.b32.xlu1 %v410_v53, %s834_s9 }
 0x11c   : > { %v463_v54 = vpop.permute.xlu0 %462 }
 0x11d   : > { %v465_v55 = vpop.permute.xlu1 %464 }
 0x11e   : > { %488 = vrot.lane.b32.xlu0 %v407_v51, %s834_s9  ;;  %v492_v56 = vsel %vm490_vm3, %v463_v54, %v465_v55 }
 0x11f   : > { %519 = vmatprep.subr.bf16.mxu0 %v492_v56 }
 0x120   : > { %v461_v57 = vpop.permute.xlu0 %460 }
 0x121   : > { %v491_v58 = vsel %vm490_vm3, %v461_v57, %v463_v54 }
 0x122   : > { %520 = vmatpush1.bf16.msra.mxu0 %v491_v58 }
 0x174   : > { %v471_v59 = vpop.permute.xlu0 %470 }
 0x178   : > { %v477_v60 = vpop.permute.xlu1 %476 }
 0x17c   : > { %v469_v61 = vpop.permute.xlu1 %468  ;;  %v483_v62 = vpop.permute.xlu0 %482 }
 0x17d   : > { %v494_v63 = vsel %vm490_vm3, %v469_v61, %v471_v59 }
 0x17e   : > { %521 = vmatprep.subr.bf16.mxu0 %v494_v63 }
 0x180   : > { %v475_v0 = vpop.permute.xlu0 %474 }
 0x181   : > { %v467_v1 = vpop.permute.xlu1 %466  ;;  %v496_v3 = vsel %vm490_vm3, %v475_v0, %v477_v60 }
 0x182   : > { %v493_v2 = vsel %vm490_vm3, %v467_v1, %v469_v61 }
 0x183   : > { %522 = vmatpush1.bf16.msra.mxu0 %v493_v2 }
 0x184   : > { %523 = vmatprep.subr.bf16.mxu0 %v496_v3 }
 0x185   : > { %v481_v4 = vpop.permute.xlu1 %480  ;;  %v473_v5 = vpop.permute.xlu0 %472 }
 0x186   : > { %v495_v6 = vsel %vm490_vm3, %v473_v5, %v475_v0  ;;  %v498_v7 = vsel %vm490_vm3, %v481_v4, %v483_v62 }
 0x187   : > { %524 = vmatpush1.bf16.msra.mxu0 %v495_v6 }
 0x188   : > { %525 = vmatprep.subr.bf16.mxu0 %v498_v7 }
 0x189   : > { %v479_v8 = vpop.permute.xlu1 %478 }
 0x18a   : > { %v497_v9 = vsel %vm490_vm3, %v479_v8, %v481_v4 }
 0x18b   : > { %526 = vmatpush1.bf16.msra.mxu0 %v497_v9 }
 0x18c   : > { %v485_v10 = vpop.permute.xlu0 %484 }
 0x18d   : > { %v487_v11 = vpop.permute.xlu1 %486 }
 0x18e   : > { %v499_v12 = vsel %vm490_vm3, %v485_v10, %v487_v11 }
 0x18f   : > { %v514_v15 = vsel %vm411_vm11, %v499_v12, 0 }
 0x190   : > { %v489_v13 = vpop.permute.xlu0 %488 }
 0x191   : > { %v500_v14 = vsel %vm490_vm3, %v487_v11, %v489_v13 }
 0x192   : > { %767 = vmatprep.subr.msk.bf16.mxu0 %vm411_vm11, %v500_v14 }
 0x193   : > { %528 = vmatpush1.bf16.msra.mxu0 %v514_v15 }
 0x196   : > { %768 = vmatmul.mubr.msk.bf16.vlgmr.msra.gmra.mrb[0].mxu0 %vm509_vm4, %v199_v16 }
 0x269   : > { %v553_v17 = vpop.f32.mrb[0].mxu0 }
 0x26a   : > { %v555_v18 = vpop.f32.mrb[1].mxu0  ;;  %v616_v19 = vsel %vm615_vm5, %v553_v17, 0.0  ;;  %v562_v20 = vsel %vm411_vm11, %v553_v17, 0.0 }
 0x26b   : > { %v557_v21 = vpop.f32.mrb[2].mxu0  ;;  %v617_v22 = vsel %vm615_vm5, %v555_v18, 0.0  ;;  %v563_v23 = vsel %vm411_vm11, %v555_v18, 0.0 }
 0x26c   : > { %v558_v24 = vpop.f32.mrb[3].mxu0  ;;  %v618_v25 = vadd.f32 %v617_v22, %v616_v19  ;;  %v564_v26 = vadd.f32 %v563_v23, %v562_v20  ;;  %v561_v22 = vld [vmem:[%s989_s3] sm:$0xff] }
 0x26e   : > { %619 = vadd.xlane.f32.xlu1 %v618_v25  ;;  %565 = vadd.xlane.f32.xlu0 %v564_v26 }
 0x2fb   : > { %v620_v27 = vpop.xlane.xlu1 %619  ;;  %v566_v28 = vpop.xlane.xlu0 %565 }
 0x2fc   : > { %v622_v29 = vrot.slane %v620_v27, 4  ;;  %v567_v30 = vsel %vm411_vm11, %v566_v28, 0.0 }
 0x2fd   : > { %v568_v31 = vrot.slane %v567_v30, 4 }
 0x2fe   : > { %v624_v32 = vsel %vm411_vm11, %v622_v29, 0.0 }
 0x2ff   : > { %v625_v33 = vrot.slane %v624_v32, 4  ;;  %v569_v34 = vadd.f32 %v568_v31, %v567_v30 }
 0x301   : > { %v626_v35 = vadd.f32 %v625_v33, %v624_v32  ;;  %v570_v36 = vrot.slane %v569_v34, 2 }
 0x303   : > { %v627_v37 = vrot.slane %v626_v35, 2  ;;  %v571_v38 = vadd.f32 %v570_v36, %v569_v34 }
 0x305   : > { %v628_v39 = vadd.f32 %v627_v37, %v626_v35  ;;  %v572_v40 = vrot.slane %v571_v38, 1 }
 0x307   : > { %v629_v41 = vrot.slane %v628_v39, 1  ;;  %v573_v42 = vadd.f32 %v572_v40, %v571_v38 }
 0x309   : > { %v630_v43 = vadd.f32 %v629_v41, %v628_v39  ;;  %v574_v44 = vmul.f32 0.0009765625, %v573_v42 }
 0x30b   : > { %v631_v45 = vmul.f32 0.0009765625, %v630_v43  ;;  %v575_v46 = vsub.f32 %v553_v17, %v574_v44  ;;  %v576_v47 = vsub.f32 %v555_v18, %v574_v44 }
 0x30d   : > { %v577_v48 = vmul.f32 %v575_v46, %v575_v46  ;;  %v578_v49 = vmul.f32 %v576_v47, %v576_v47  ;;  %v632_v50 = vsub.f32 %v553_v17, %v631_v45  ;;  %v633_v51 = vsub.f32 %v555_v18, %v631_v45  ;;  %v560_v17 = vld [vmem:[%s988_s2] sm:$0xff] }
 0x30f   : > { %v579_v52 = vsel %vm411_vm11, %v577_v48, 0.0  ;;  %v580_v53 = vsel %vm411_vm11, %v578_v49, 0.0  ;;  %v634_v54 = vmul.f32 %v632_v50, %v632_v50  ;;  %v635_v55 = vmul.f32 %v633_v51, %v633_v51 }
 0x310   : > { %v581_v56 = vadd.f32 %v580_v53, %v579_v52 }
 0x311   : > { %v636_v57 = vsel %vm615_vm5, %v634_v54, 0.0  ;;  %v637_v58 = vsel %vm615_vm5, %v635_v55, 0.0 }
 0x312   : > { %582 = vadd.xlane.f32.xlu1 %v581_v56  ;;  %v638_v59 = vadd.f32 %v637_v58, %v636_v57 }
 0x314   : > { %639 = vadd.xlane.f32.xlu0 %v638_v59 }
 0x39f   : > { %v583_v60 = vpop.xlane.xlu1 %582 }
 0x3a0   : > { %v584_v61 = vsel %vm411_vm11, %v583_v60, 0.0 }
 0x3a1   : > { %v585_v62 = vrot.slane %v584_v61, 4  ;;  %v640_v63 = vpop.xlane.xlu0 %639 }
 0x3a2   : > { %v642_v0 = vrot.slane %v640_v63, 4 }
 0x3a3   : > { %v586_v1 = vadd.f32 %v585_v62, %v584_v61 }
 0x3a4   : > { %v644_v2 = vsel %vm411_vm11, %v642_v0, 0.0 }
 0x3a5   : > { %v587_v3 = vrot.slane %v586_v1, 2  ;;  %v645_v4 = vrot.slane %v644_v2, 4 }
 0x3a7   : > { %v588_v5 = vadd.f32 %v587_v3, %v586_v1  ;;  %v646_v6 = vadd.f32 %v645_v4, %v644_v2 }
 0x3a9   : > { %v589_v7 = vrot.slane %v588_v5, 1  ;;  %v647_v8 = vrot.slane %v646_v6, 2 }
 0x3ab   : > { %v590_v9 = vadd.f32 %v589_v7, %v588_v5  ;;  %v648_v10 = vadd.f32 %v647_v8, %v646_v6 }
 0x3ad   : > { %v591_v11 = vmul.f32 0.0009765625, %v590_v9  ;;  %v649_v12 = vrot.slane %v648_v10, 1 }
 0x3af   : > { %v592_v13 = vadd.f32 1e-05, %v591_v11  ;;  %v650_v14 = vadd.f32 %v649_v12, %v648_v10 }
 0x3b1   : > { %807 = vrsqrt.f32 %v592_v13  ;;  %v651_v15 = vmul.f32 0.0009765625, %v650_v14 }
 0x3b3   : > { %v652_v16 = vadd.f32 1e-05, %v651_v15 }
 0x3b5   : > { %809 = vrsqrt.f32 %v652_v16 }
 0x3bb   : > { %v808_v18 = vpop.eup %807 }
 0x3bc   : > { %v594_v19 = vmul.f32 %v808_v18, %v560_v17 }
 0x3be   : > { %597 = vperm.xlu0 %802, %v594_v19  }
 0x3bf   : > { %v810_v20 = vpop.eup %809 }
 0x3c0   : > { %v654_v21 = vmul.f32 %v810_v20, %v560_v17 }
 0x3c2   : > { %657 = vperm.xlu1 %803, %v654_v21  }
 0x3c6   : > { %604 = vperm.xlu1 %803, %v561_v22  }
 0x43d   : > { %v598_v23 = vpop.permute.xlu0 %597 }
 0x43e   : > { %v600_v25 = vmul.f32 %v598_v23, %v575_v46  ;;  %v601_v26 = vmul.f32 %v598_v23, %v576_v47 }
 0x441   : > { %v658_v24 = vpop.permute.xlu1 %657 }
 0x442   : > { %v660_v27 = vmul.f32 %v658_v24, %v632_v50  ;;  %v661_v28 = vmul.f32 %v658_v24, %v633_v51 }
 0x445   : > { %v605_v29 = vpop.permute.xlu1 %604 }
 0x446   : > { %v607_v30 = vadd.f32 %v605_v29, %v600_v25  ;;  %v608_v31 = vadd.f32 %v605_v29, %v601_v26  ;;  %v662_v32 = vadd.f32 %v660_v27, %v605_v29  ;;  %v663_v33 = vadd.f32 %v661_v28, %v605_v29 }
 0x448   : > { %vm609_vm6 = vcmp.gt.f32.partialorder %v607_v30, 0.0  ;;  %vm610_vm7 = vcmp.gt.f32.partialorder %v608_v31, 0.0  ;;  %v611_v34 = vmul.f32 0.2, %v607_v30  ;;  %v612_v35 = vmul.f32 0.2, %v608_v31 }
 0x449   : > { %vm664_vm8 = vcmp.gt.f32.partialorder %v662_v32, 0.0  ;;  %vm665_vm9 = vcmp.gt.f32.partialorder %v663_v33, 0.0  ;;  %v666_v36 = vmul.f32 0.2, %v662_v32  ;;  %v667_v37 = vmul.f32 0.2, %v663_v33 }
 0x44a   : > { %v613_v38 = vsel %vm609_vm6, %v607_v30, %v611_v34  ;;  %v614_v39 = vsel %vm610_vm7, %v608_v31, %v612_v35 }
 0x44b   : > { %v668_v40 = vsel %vm664_vm8, %v662_v32, %v666_v36  ;;  %v669_v41 = vsel %vm665_vm9, %v663_v33, %v667_v37 }
 0x44c   : > { %v670_v42 = vsel %vm411_vm11, %v613_v38, %v668_v40  ;;  %v671_v43 = vsel %vm411_vm11, %v614_v39, %v669_v41 }
 0x44d   : > { %v775_v44 = vpack.c.bf16 %v671_v43, %v670_v42 }
 0x44f   : > { %680 = vst [vmem:[%s197_s21] sm:$0xff] %v775_v44 }
 0x450 PF: > { %s14_s15 = sadd.s32 1, %s817_s15  }
 0x451   : > { %p11_p4 = scmp.ge.s32.totalorder %s14_s15, 4  }
 0x453   :  { %13 = sbr.rel (!%p11_p4) target bundleno = 1 (0x1), region = 66 }

</bundles_post_ra>
